<compile_context>
chip_gen: v7x
topology: tpu7x:2x2x1
jax: 0.10.0
libtpu: 0.0.40
codegen_flags: <defaults>
</compile_context>

<pallas_src>
import functools

import jax
import jax.numpy as jnp
from jax.experimental import pallas as pl
from jax.experimental.pallas import tpu as pltpu


# ----------------------------------------------------------------------------
# Fused MLP kernel: all layers in one grid step (grid tiles only the last layer
# along the output-feature axis).
# ----------------------------------------------------------------------------
def _fused_mlp_kernel(*refs, n_hidden, leakiness):
    # refs layout:
    #   refs[0]                      x_ref       (B, K0)     input (z ++ a)
    #   refs[1 + 2*i], refs[2 + 2*i] wh_i, bh_i  hidden layer i params (full)
    #   refs[-3], refs[-2]           w_last, b_last  (H, TN), (1, TN) tile
    #   refs[-1]                     o_ref       (B, TN)
    x_ref = refs[0]
    w_last_ref = refs[-3]
    b_last_ref = refs[-2]
    o_ref = refs[-1]

    h = x_ref[...].astype(jnp.float32)

    # Hidden layers: (B, H) activations live entirely in vregs/VMEM.
    for i in range(n_hidden):
        w_ref = refs[1 + 2 * i]
        b_ref = refs[2 + 2 * i]
        y = jnp.dot(h.astype(w_ref.dtype), w_ref[...],
                    preferred_element_type=jnp.float32)
        y = y + b_ref[...].astype(jnp.float32)
        h = jnp.where(y > 0, y, leakiness * y)          # LeakyReLU (f32 VPU)

    # Final wide layer: this grid step's (H, TN) weight slab, then ReLU.
    y = jnp.dot(h.astype(w_last_ref.dtype), w_last_ref[...],
                preferred_element_type=jnp.float32)
    y = y + b_last_ref[...].astype(jnp.float32)
    o_ref[...] = jnp.maximum(y, 0.0).astype(o_ref.dtype)


def fused_mlp_forward(x, hidden_params, last_w, last_b, *,
                      leakiness, out_dtype=jnp.float32):
    """out = ReLU(LeakyReLU(...(x @ Wh + bh)...) @ W_last + b_last), fused."""
    B, K0 = x.shape
    H_last, N = last_w.shape
    n_hidden = len(hidden_params)

    # Tile only the last (wide) layer along N.  Prefer 2 lane-dense tiles so
    # v7x megacore can shard the HBM-bound weight streaming across both TCs;
    # everything comfortably fits VMEM at these sizes.
    if N >= 2048 and N % 1024 == 0:
        tn = 1024
    else:
        tn = N
    grid = (N // tn,)

    in_specs = [pl.BlockSpec((B, K0), lambda j: (0, 0))]
    inputs = [x]
    for (w, b) in hidden_params:
        di, do = w.shape
        in_specs.append(pl.BlockSpec((di, do), lambda j: (0, 0)))
        in_specs.append(pl.BlockSpec((1, do), lambda j: (0, 0)))
        inputs.append(w)
        inputs.append(b.reshape(1, do))
    in_specs.append(pl.BlockSpec((H_last, tn), lambda j: (0, j)))
    in_specs.append(pl.BlockSpec((1, tn), lambda j: (0, j)))
    inputs.append(last_w)
    inputs.append(last_b.reshape(1, N))

    kernel = functools.partial(_fused_mlp_kernel,
                               n_hidden=n_hidden, leakiness=leakiness)
    return pl.pallas_call(
        kernel,
        out_shape=jax.ShapeDtypeStruct((B, N), out_dtype),
        grid_spec=pl.GridSpec(
            grid=grid,
            in_specs=in_specs,
            out_specs=pl.BlockSpec((B, tn), lambda j: (0, j)),
        ),
        compiler_params=pltpu.CompilerParams(
            dimension_semantics=("parallel",)),
    )(*inputs)


# ----------------------------------------------------------------------------
# GeneratorAC forward (module wrapper)
# ----------------------------------------------------------------------------
class GeneratorACPallas:
    def __init__(self, n_attr, d_noise, n_hlayer, n_hunit,
                 normalize_noise=0, dropout=0.0, leakiness=0.2, *,
                 key=jax.random.PRNGKey(42),
                 param_dtype=jnp.bfloat16, out_dtype=jnp.float32):
        self.n_attr = n_attr
        self.d_noise = d_noise
        self.n_hlayer = n_hlayer
        self.n_hunit = n_hunit
        self.normalize_noise = normalize_noise
        self.dropout = dropout
        self.leakiness = leakiness
        self.out_dtype = out_dtype

        # Deterministic synthetic parameter init (stand-in for variable_init):
        # N(0, 0.02) weights, zero biases.  Weights stored bf16 (HBM-BW win),
        # biases kept f32 (added post-accumulation in f32).
        d_in = n_attr + d_noise
        dims = []
        if n_hlayer > 0:
            dims.append((d_in, n_hunit))
            for _ in range(1, n_hlayer):
                dims.append((n_hunit, n_hunit))
            dims.append((n_hunit, 2048))
        else:
            dims.append((d_in, 2048))

        params = []
        for (di, do) in dims:
            key, wk = jax.random.split(key)
            w = (0.02 * jax.random.normal(wk, (di, do), jnp.float32)
                 ).astype(param_dtype)
            b = jnp.zeros((do,), jnp.float32)
            params.append((w, b))
        self.hidden_params = params[:-1]
        self.last_w, self.last_b = params[-1]

        # One jit covering noise gen + normalize + concat + fused pallas_call.
        self._forward = jax.jit(self._forward_impl)

    def _forward_impl(self, a, noise_key, hidden_params, last_w, last_b):
        a = a.astype(jnp.float32)
        n_sample = a.shape[0]
        z = jax.random.normal(noise_key, (n_sample, self.d_noise), jnp.float32)
        if self.normalize_noise:
            # Matches torch.nn.functional.normalize(z, dim=1, p=2, eps=1e-12):
            # divide by the L2 norm clamped at eps.
            norm = jnp.sqrt(jnp.sum(z * z, axis=1, keepdims=True))
            z = z / jnp.maximum(norm, 1e-12)
        x = jnp.concatenate([z, a], axis=1)
        # TODO(synk): training-mode dropout (p>0) not applied; with the default
        # dropout=0.0 (or eval mode) this matches the PyTorch module exactly.
        return fused_mlp_forward(x, hidden_params, last_w, last_b,
                                 leakiness=self.leakiness,
                                 out_dtype=self.out_dtype)

    def __call__(self, a, *, noise_key):
        return self._forward(a, noise_key, self.hidden_params,
                             self.last_w, self.last_b)


if __name__ == "__main__":
    key = jax.random.PRNGKey(0)
    k_attr, k_noise, k_noise2 = jax.random.split(key, 3)

    # Case 1: batch=8, n_attr=16, d_noise=16, n_hlayer=2, n_hunit=32 -> (8, 2048)
    n_attr, d_noise, n_hlayer, n_hunit = 16, 16, 2, 32
    batch = 8
    a = jax.random.normal(k_attr, (batch, n_attr), jnp.float32)

    gen = GeneratorACPallas(n_attr, d_noise, n_hlayer, n_hunit,
                            normalize_noise=1, dropout=0.0, leakiness=0.2)
    out = jax.block_until_ready(gen(a, noise_key=k_noise))
    assert out.shape == (batch, 2048)
    assert bool(jnp.all(out >= 0.0))           # final ReLU
    assert bool(jnp.all(jnp.isfinite(out)))
    assert bool(jnp.any(out > 0.0))            # not degenerate

    # Case 2: n_hlayer=0 path (single Linear(d_in, 2048) + ReLU)
    gen0 = GeneratorACPallas(n_attr, d_noise, 0, n_hunit,
                             normalize_noise=0, dropout=0.0, leakiness=0.2)
    out0 = jax.block_until_ready(gen0(a, noise_key=k_noise2))
    assert out0.shape == (batch, 2048)
    assert bool(jnp.all(out0 >= 0.0))
    assert bool(jnp.all(jnp.isfinite(out0)))

    print("KERNEL_OK")
</pallas_src>

<mosaic_0001>
module attributes {stable_mosaic.version = 11 : i64} {
  func.func @_fused_mlp_kernel(%arg0: i32, %arg1: memref<8x32xf32, #tpu.memory_space<vmem>>, %arg2: memref<32x32xbf16, #tpu.memory_space<vmem>>, %arg3: memref<1x32xf32, #tpu.memory_space<vmem>>, %arg4: memref<32x32xbf16, #tpu.memory_space<vmem>>, %arg5: memref<1x32xf32, #tpu.memory_space<vmem>>, %arg6: memref<32x1024xbf16, #tpu.memory_space<vmem>>, %arg7: memref<1x1024xf32, #tpu.memory_space<vmem>>, %arg8: memref<8x1024xf32, #tpu.memory_space<vmem>>) attributes {dimension_semantics = [#tpu.dimension_semantics<parallel>], iteration_bounds = array<i64: 2>, scalar_prefetch = 0 : i64, scratch_operands = 0 : i64, tpu.core_type = #tpu.core_type<tc>, window_params = [{pipeline_mode = #tpu.pipeline_mode<synchronous>, transform_indices = @transform_0, window_bounds = array<i64: 8, 32>}, {pipeline_mode = #tpu.pipeline_mode<synchronous>, transform_indices = @transform_1, window_bounds = array<i64: 32, 32>}, {pipeline_mode = #tpu.pipeline_mode<synchronous>, transform_indices = @transform_2, window_bounds = array<i64: 1, 32>}, {pipeline_mode = #tpu.pipeline_mode<synchronous>, transform_indices = @transform_3, window_bounds = array<i64: 32, 32>}, {pipeline_mode = #tpu.pipeline_mode<synchronous>, transform_indices = @transform_4, window_bounds = array<i64: 1, 32>}, {transform_indices = @transform_5, window_bounds = array<i64: 32, 1024>}, {transform_indices = @transform_6, window_bounds = array<i64: 1, 1024>}, {transform_indices = @transform_7, window_bounds = array<i64: 8, 1024>}]} {
    %c0 = arith.constant 0 : index
    %c0_0 = arith.constant 0 : index
    %0 = vector.load %arg1[%c0, %c0_0] : memref<8x32xf32, #tpu.memory_space<vmem>>, vector<8x32xf32>
    %1 = arith.truncf %0 : vector<8x32xf32> to vector<8x32xbf16>
    %c0_1 = arith.constant 0 : index
    %c0_2 = arith.constant 0 : index
    %2 = vector.load %arg2[%c0_1, %c0_2] : memref<32x32xbf16, #tpu.memory_space<vmem>>, vector<32x32xbf16>
    %cst = arith.constant dense<0.000000e+00> : vector<8x32xf32>
    %3 = tpu.matmul %1, %2, %cst {dimension_numbers = #tpu.dot_dimension_numbers<[1], [0], [0], [1], [0, 0, 1, 1], [], []>} : vector<8x32xbf16>, vector<32x32xbf16>, vector<8x32xf32> -> vector<8x32xf32>
    %c0_3 = arith.constant 0 : index
    %c0_4 = arith.constant 0 : index
    %4 = vector.load %arg3[%c0_3, %c0_4] : memref<1x32xf32, #tpu.memory_space<vmem>>, vector<1x32xf32>
    %5 = vector.broadcast %4 : vector<1x32xf32> to vector<8x32xf32>
    %6 = arith.addf %3, %5 : vector<8x32xf32>
    %cst_5 = arith.constant 0.000000e+00 : f32
    %7 = vector.broadcast %cst_5 : f32 to vector<8x32xf32>
    %8 = arith.cmpf ogt, %6, %7 : vector<8x32xf32>
    %cst_6 = arith.constant 2.000000e-01 : f32
    %9 = vector.broadcast %cst_6 : f32 to vector<8x32xf32>
    %10 = arith.mulf %9, %6 : vector<8x32xf32>
    %11 = arith.select %8, %6, %10 : vector<8x32xi1>, vector<8x32xf32>
    %12 = arith.truncf %11 : vector<8x32xf32> to vector<8x32xbf16>
    %c0_7 = arith.constant 0 : index
    %c0_8 = arith.constant 0 : index
    %13 = vector.load %arg4[%c0_7, %c0_8] : memref<32x32xbf16, #tpu.memory_space<vmem>>, vector<32x32xbf16>
    %cst_9 = arith.constant dense<0.000000e+00> : vector<8x32xf32>
    %14 = tpu.matmul %12, %13, %cst_9 {dimension_numbers = #tpu.dot_dimension_numbers<[1], [0], [0], [1], [0, 0, 1, 1], [], []>} : vector<8x32xbf16>, vector<32x32xbf16>, vector<8x32xf32> -> vector<8x32xf32>
    %c0_10 = arith.constant 0 : index
    %c0_11 = arith.constant 0 : index
    %15 = vector.load %arg5[%c0_10, %c0_11] : memref<1x32xf32, #tpu.memory_space<vmem>>, vector<1x32xf32>
    %16 = vector.broadcast %15 : vector<1x32xf32> to vector<8x32xf32>
    %17 = arith.addf %14, %16 : vector<8x32xf32>
    %cst_12 = arith.constant 0.000000e+00 : f32
    %18 = vector.broadcast %cst_12 : f32 to vector<8x32xf32>
    %19 = arith.cmpf ogt, %17, %18 : vector<8x32xf32>
    %cst_13 = arith.constant 2.000000e-01 : f32
    %20 = vector.broadcast %cst_13 : f32 to vector<8x32xf32>
    %21 = arith.mulf %20, %17 : vector<8x32xf32>
    %22 = arith.select %19, %17, %21 : vector<8x32xi1>, vector<8x32xf32>
    %23 = arith.truncf %22 : vector<8x32xf32> to vector<8x32xbf16>
    %c0_14 = arith.constant 0 : index
    %c0_15 = arith.constant 0 : index
    %24 = vector.load %arg6[%c0_14, %c0_15] : memref<32x1024xbf16, #tpu.memory_space<vmem>>, vector<32x1024xbf16>
    %cst_16 = arith.constant dense<0.000000e+00> : vector<8x1024xf32>
    %25 = tpu.matmul %23, %24, %cst_16 {dimension_numbers = #tpu.dot_dimension_numbers<[1], [0], [0], [1], [0, 0, 1, 1], [], []>} : vector<8x32xbf16>, vector<32x1024xbf16>, vector<8x1024xf32> -> vector<8x1024xf32>
    %c0_17 = arith.constant 0 : index
    %c0_18 = arith.constant 0 : index
    %26 = vector.load %arg7[%c0_17, %c0_18] : memref<1x1024xf32, #tpu.memory_space<vmem>>, vector<1x1024xf32>
    %27 = vector.broadcast %26 : vector<1x1024xf32> to vector<8x1024xf32>
    %28 = arith.addf %25, %27 : vector<8x1024xf32>
    %cst_19 = arith.constant 0.000000e+00 : f32
    %29 = vector.broadcast %cst_19 : f32 to vector<8x1024xf32>
    %30 = arith.maximumf %28, %29 : vector<8x1024xf32>
    %c0_20 = arith.constant 0 : index
    %c0_21 = arith.constant 0 : index
    %31 = vector.load %arg8[%c0_20, %c0_21] : memref<8x1024xf32, #tpu.memory_space<vmem>>, vector<8x1024xf32>
    tpu.vector_store %arg8[%c0_20, %c0_21], %30 {strides = array<i32>} : memref<8x1024xf32, #tpu.memory_space<vmem>>, vector<8x1024xf32>,
    return
  }
  func.func @transform_0(%arg0: i32) -> (i32, i32) {
    %c0_i32 = arith.constant 0 : i32
    %c0_i32_0 = arith.constant 0 : i32
    %c0_i32_1 = arith.constant 0 : i32
    return %c0_i32, %c0_i32_0 : i32, i32
  }
  func.func @transform_1(%arg0: i32) -> (i32, i32) {
    %c0_i32 = arith.constant 0 : i32
    %c0_i32_0 = arith.constant 0 : i32
    %c0_i32_1 = arith.constant 0 : i32
    return %c0_i32, %c0_i32_0 : i32, i32
  }
  func.func @transform_2(%arg0: i32) -> (i32, i32) {
    %c0_i32 = arith.constant 0 : i32
    %c0_i32_0 = arith.constant 0 : i32
    %c0_i32_1 = arith.constant 0 : i32
    return %c0_i32, %c0_i32_0 : i32, i32
  }
  func.func @transform_3(%arg0: i32) -> (i32, i32) {
    %c0_i32 = arith.constant 0 : i32
    %c0_i32_0 = arith.constant 0 : i32
    %c0_i32_1 = arith.constant 0 : i32
    return %c0_i32, %c0_i32_0 : i32, i32
  }
  func.func @transform_4(%arg0: i32) -> (i32, i32) {
    %c0_i32 = arith.constant 0 : i32
    %c0_i32_0 = arith.constant 0 : i32
    %c0_i32_1 = arith.constant 0 : i32
    return %c0_i32, %c0_i32_0 : i32, i32
  }
  func.func @transform_5(%arg0: i32) -> (i32, i32) {
    %c0_i32 = arith.constant 0 : i32
    %c0_i32_0 = arith.constant 0 : i32
    return %c0_i32, %arg0 : i32, i32
  }
  func.func @transform_6(%arg0: i32) -> (i32, i32) {
    %c0_i32 = arith.constant 0 : i32
    %c0_i32_0 = arith.constant 0 : i32
    return %c0_i32, %arg0 : i32, i32
  }
  func.func @transform_7(%arg0: i32) -> (i32, i32) {
    %c0_i32 = arith.constant 0 : i32
    %c0_i32_0 = arith.constant 0 : i32
    return %c0_i32, %arg0 : i32, i32
  }
}

</mosaic_0001>

<bundles_post_ra>
// kernel: _forward_impl.1
= control target key start
LH: loop header
LB: loop body
LE: loop exit
PB: predicated region body
PF: predicated region fallthrough
CT: control target
= control target key end

     0   :  { %12 = vsyncpa [#allocation3], 0  ;;  %s1369_s0 = inlined_call_operand.vmem [shape: f32[8,32], index: 0, kind: input, shape index: {}]   ;;  %s1370_s1 = inlined_call_operand.vmem [shape: bf16[32,32], index: 1, kind: input, shape index: {}]   ;;  %s1371_s2 = inlined_call_operand.vmem [shape: f32[1,32], index: 2, kind: input, shape index: {}]   ;;  %s1372_s3 = inlined_call_operand.vmem [shape: bf16[32,32], index: 3, kind: input, shape index: {}]   ;;  %s1373_s4 = inlined_call_operand.vmem [shape: f32[1,32], index: 4, kind: input, shape index: {}]   ;;  %s1374_s5 = inlined_call_operand.hbm [shape: bf16[32,2048], index: 5, kind: input, shape index: {}]   ;;  %s1375_s6 = inlined_call_operand.vmem [shape: f32[1,2048], index: 6, kind: input, shape index: {}]   ;;  %s1376_s7 = inlined_call_operand.hbm [shape: f32[8,2048], index: 7, kind: output, shape index: {}]  }
   0x1   :  { %14 = vsyncpa [#allocation3 + $0x1], 0 }
   0x2   :  { %15 = vsyncpa [#allocation4], 0 }
   0x3   :  { %17 = vsyncpa [#allocation4 + $0x1], 0  ;;  %s1146_s24 = smov 0   ;;  %s1148_s25 = smov 0  }
   0x4   :  { %s1150_s26 = smov 0   ;;  %s1152_s27 = smov 0  }
   0x5 LB: > { %s1167_s28 = sadd.s32 4294967295, %s1096_s27   ;;  %s877_s29 = sadd.s32 4294967294, %s1096_s27   ;;  %s1096_s27 = sphi %s1152_s27, %s1390_s27   ;;  %s1092_s26 = sphi %s1150_s26, %s1389_s26   ;;  %s1088_s25 = sphi %s1148_s25, %s1388_s25   ;;  %s1084_s24 = sphi %s1146_s24, %s1387_s24  }
   0x6   : > { %s1171_s30 = sadd.s32 1, %s1096_s27   ;;  %s135_s8 = sadd.s32 1, %s1092_s26 }
   0x7   : > { %s132_s9 = ssub.s32 %s1096_s27, %s1171_s30  ;;  %p142_p0 = scmp.ne.s32.totalorder %s1092_s26, %s1088_s25 }
   0x8   : > { %p133_p1 = scmp.eq.s32.totalorder %s132_s9, 0  ;;  %p143_p2 = scmp.eq.s32.totalorder %s1096_s27, 0 }
   0x9   : > { %p148_p3 = scmp.ne.s32.totalorder %s1088_s25, %s1084_s24  ;;  %p149_p4 = scmp.eq.s32.totalorder %s1167_s28, 0 }
   0xa   : > { %s1183_s10 = scalar_select %p133_p1, %s1092_s26, %s135_s8  }
   0xb   : > { %p1185_p5 = por %p143_p2, %p142_p0  ;;  %p1189_p6 = por %p149_p4, %p148_p3 }
   0xc   : > { %p198_p7 = scmp.eq.s32.totalorder %s1167_s28, 1  ;;  %p204_p8 = scmp.eq.s32.totalorder %s877_s29, 1 }
   0xd   : > { %p956_p10 = scmp.lt.s32.totalorder %s1096_s27, 2  ;;  %s239_s15 = sand.u32 1, %s1092_s26  }
   0xe   : > { %p1196_p11 = por %p198_p7, %p142_p0  ;;  %p1200_p12 = por %p204_p8, %p148_p3 }
   0xf   : > { %s920_s16 = sshll.u32 %s1096_s27, 9  ;;  %s880_s17 = sshll.u32 %s239_s15, 7 }
  0x10   : > { %s1380_s13 = scalar_select %p1196_p11, 1, 0 }
  0x11   : > { %s1381_s14 = scalar_select %p1200_p12, 1, 0 }
  0x12   : > { %s1209_s20 = scalar_lea.hbm %s1374_s5, %s920_s16  ;;  %s243_s21 = scalar_lea.vmem [#allocation2], %s880_s17 }
  0x13   : > { %s250_s22 = sshll.u32 %s243_s21, 4  ;;  %p1213_p13 = pnand %p956_p10, %p1185_p5  ;;  %s1217_s22 = int_to_ptr.vmem [resolvable:$true] %s250_s22 }
  0x14   : > { %s1220_s29 = scalar_lea.sflag [#allocation3], %s239_s15  ;;  %s1000_s8 = scalar_lea.hbm %s1209_s20, 2048 }
  0x15   : > { %p1001_p1 = scmp.ne.s32.totalorder %s1209_s20, %s1000_s8  ;;  %p1002_p2 = pneg %p1213_p13 }
  0x16   : > { %s1005_s16 = scalar_lea.hbm %s1374_s5, 4096  ;;  %p1006_p5 = scmp.lt.u32.totalorder %s1209_s20, %s1374_s5 }
  0x17   : > { %p1003_p3 = pnand %p1002_p2, %p1001_p1  ;;  %p1007_p7 = scmp.lt.u32.totalorder %s1005_s16, %s1000_s8 }
  0x18   : > { %p1009_p10 = scmp.lt.u32.totalorder %s1000_s8, %s1209_s20 }
  0x19   : > { %p1004_p4 = pneg %p1003_p3  ;;  %p1008_p8 = por %p1007_p7, %p1006_p5 }
  0x1b   : > { %p1010_p9 = por %p1009_p10, %p1008_p8 }
  0x1d   : > { %p1011_p0 = pnand %p1010_p9, %p1004_p4 }
  0x1f   : > { %1014 = shalt.err (!%p1011_p0)
}
  0x20   : > { %s1015_s15 = scalar_lea.vmem %s1217_s22, 2048  ;;  %s1098_s19 = smov [#allocation2]  }
  0x21   : > { %p1016_p1 = scmp.ne.s32.totalorder %s1217_s22, %s1015_s15  ;;  %s1020_s21 = sshll.u32 %s1098_s19, 4  ;;  %s1021_s21 = int_to_ptr.vmem [resolvable:$false] %s1020_s21 }
  0x22   : > { %s1022_s9 = scalar_lea.vmem %s1021_s21, 4096  ;;  %p1023_p11 = scmp.lt.s32.totalorder %s1217_s22, %s1021_s21 }
  0x23   : > { %p1018_p3 = pnand %p1016_p1, %p1002_p2  ;;  %p1024_p5 = scmp.lt.s32.totalorder %s1022_s9, %s1015_s15 }
  0x25   : > { %p1019_p12 = pneg %p1018_p3  ;;  %p1025_p7 = por %p1024_p5, %p1023_p11 }
  0x27   : > { %p1026_p8 = pnand %p1025_p7, %p1019_p12 }
  0x29   : > { %1029 = shalt.err (!%p1026_p8)
}
  0x2a   : > { %s1099_s8 = smov 1024   ;;  %s1100_s11 = smov 512  }
  0x2b   : > { %s1101_s16 = smov 32   ;;  %p266_p9 = scmp.lt.s32.totalorder %s1096_s27, 3 }
  0x2c   : > { %951 = dma.hbm_to_vmem [thread:$0]  (!%p1213_p13), %s1209_s20, 2048, %s1217_s22, %s1220_s29, %s1099_s8, %s1100_s11, %s1101_s16  }
  0x2d   : > { %p1383_p0 = scmp.ge.s32.totalorder %s1096_s27, 1 }
  0x2f   : > { %p267_p2 = pnand %p1383_p0, %p266_p9 }
  0x30   : > { %s1252_s17 = sand.u32 (!%p267_p2), 1, %s1088_s25  }
  0x31   : > { %270 = sbr.rel (%p267_p2) target bundleno = 744 (0x2e8), region = 48  ;;  %s884_s18 = sshll.u32 (!%p267_p2), %s1252_s17, 7 }
  0x32   : > { %s273_s15 = scalar_lea.sflag (!%p267_p2), [#allocation3], %s1252_s17  ;;  %s1256_s19 = scalar_lea.vmem (!%p267_p2), [#allocation2], %s884_s18 }
  0x38   : > { %1075 = dma.done.wait (%p1189_p6), %s273_s15, 2048  }
  0x39   : > { %1077 = vsyncadd (%p1189_p6), %s273_s15, 4294965248  ;;  %v1102_v0 = vmov 0.0   ;;  %vm1103_vm0 = vmmov 0   ;;  %v996_v1 = vld [vmem:[%s1370_s1] sm:$0xff]   ;;  %v997_v2 = vld [vmem:[%s1370_s1 + $0x8] sm:$0xff]   ;;  %vm344_vm1 = vcmask 261120   ;;  %v480_v58 = vlaneseq }
  0x3a   : > { %928 = vmatprep.subr.bf16.mxu0 %v1102_v0  ;;  %932 = vmatprep.mubr.msk.bf16.mxu0 %vm1103_vm0, %v1102_v0  ;;  %v319_v3 = vld [vmem:[%s1369_s0] sm:$0xff]  ;;  %v999_v6 = vld [vmem:[%s1372_s3 + $0x8] sm:$0xff]   ;;  %v464_v32 = vld [vmem:[%s1256_s19 + $0x10] sm:$0xff]  ;;  %v1104_v38 = vmov 0   ;;  %s885_s21 = sshll.u32 %s1252_s17, 6  ;;  %s921_s8 = sshll.u32 %s1167_s28, 10 }
  0x3b   : > { %936 = vmatprep.subr.bf16.mxu1 %v1102_v0  ;;  %940 = vmatprep.mubr.msk.bf16.mxu1 %vm1103_vm0, %v1102_v0  ;;  %v320_v4 = vpack.c.bf16 %v319_v3, %v319_v3  ;;  %v998_v5 = vld [vmem:[%s1372_s3] sm:$0xff]   ;;  %v463_v9 = vld [vmem:[%s1256_s19 + $0x8] sm:$0xff]  ;;  %v468_v33 = vld [vmem:[%s1256_s19 + $0x30] sm:$0xff]  ;;  %v481_v59 = vshrl.u32 %v480_v58, 7  ;;  %s1310_s9 = scalar_lea.vmem [#allocation5], %s885_s21  ;;  %s1321_s15 = scalar_lea.hbm %s1376_s7, %s921_s8 }
  0x3c   : > { %929 = vmatpush3.bf16.msra.mxu0 %v996_v1  ;;  %937 = vmatpush3.bf16.msra.mxu1 %v998_v5  ;;  %v462_v7 = vld [vmem:[%s1256_s19] sm:$0xff]  ;;  %v467_v12 = vld [vmem:[%s1256_s19 + $0x28] sm:$0xff]  ;;  %v465_v34 = vld [vmem:[%s1256_s19 + $0x18] sm:$0xff]  ;;  %v899_v35 = vcombine.low %v464_v32, %v468_v33  ;;  %v900_v36 = vcombine.high %v464_v32, %v468_v33  ;;  %s798_s11 = sshll.u32 %s1310_s9, 4  ;;  %p1384_p12 = scmp.ne.s32.totalorder %s1380_s13, 0  ;;  %s1323_s11 = int_to_ptr.vmem [resolvable:$true] %s798_s11 }
  0x3d   : > { %930 = vmatprep.subr.bf16.mxu0 %v1102_v0  ;;  %938 = vmatprep.subr.bf16.mxu1 %v1102_v0  ;;  %v466_v8 = vld [vmem:[%s1256_s19 + $0x20] sm:$0xff]  ;;  %v897_v13 = vcombine.low %v463_v9, %v467_v12  ;;  %v898_v14 = vcombine.high %v463_v9, %v467_v12  ;;  %v471_v26 = vld [vmem:[%s1256_s19 + $0x48] sm:$0xff]  ;;  %v469_v37 = vld [vmem:[%s1256_s19 + $0x38] sm:$0xff]  ;;  %v482_v60 = vsub.s32 0, %v481_v59  ;;  %v490_v61 = vsub.s32 2, %v481_v59  ;;  %s1030_s20 = scalar_lea.vmem %s1323_s11, 1024 }
  0x3e   : > { %v895_v10 = vcombine.low %v462_v7, %v466_v8  ;;  %v896_v11 = vcombine.high %v462_v7, %v466_v8  ;;  %v887_v15 = vld [vmem:[%s1371_s2] ss:$0 sm:$0xff]  ;;  %v475_v28 = vld [vmem:[%s1256_s19 + $0x68] sm:$0xff]  ;;  %v901_v39 = vcombine.low %v465_v34, %v469_v37  ;;  %v902_v40 = vcombine.high %v465_v34, %v469_v37  ;;  %v472_v46 = vld [vmem:[%s1256_s19 + $0x50] sm:$0xff]  ;;  %p1031_p11 = scmp.ne.s32.totalorder %s1323_s11, %s1030_s20  ;;  %s1105_s22 = smov [#allocation5]  }
  0x3f   : > { %v470_v24 = vld [vmem:[%s1256_s19 + $0x40] sm:$0xff]  ;;  %v905_v30 = vcombine.low %v471_v26, %v475_v28  ;;  %v906_v31 = vcombine.high %v471_v26, %v475_v28  ;;  %v476_v47 = vld [vmem:[%s1256_s19 + $0x70] sm:$0xff]  ;;  %v473_v50 = vld [vmem:[%s1256_s19 + $0x58] sm:$0xff]  ;;  %v486_v63 = vsub.s32 1, %v481_v59  ;;  %v494_v0 = vsub.s32 3, %v481_v59 }
  0x40   : > { %931 = vmatpush3.bf16.msra.mxu0 %v997_v2  ;;  %939 = vmatpush3.bf16.msra.mxu1 %v999_v6  ;;  %v474_v25 = vld [vmem:[%s1256_s19 + $0x60] sm:$0xff]  ;;  %v477_v51 = vld [vmem:[%s1256_s19 + $0x78] sm:$0xff]  ;;  %v908_v54 = vcombine.high %v472_v46, %v476_v47  ;;  %v907_v56 = vcombine.low %v472_v46, %v476_v47  ;;  %s886_s19 = sshll.u32 %s1167_s28, 3  ;;  %v506_v12 = vsub.s32 6, %v481_v59  ;;  %s784_s28 = scalar_lea.sflag [#allocation4], %s1252_s17 }
  0x41   : > { %603 = vmatprep.subr.bf16.mxu0 %v896_v11  ;;  %644 = vmatprep.subr.bf16.mxu1 %v898_v14  ;;  %v904_v27 = vcombine.high %v470_v24, %v474_v25  ;;  %v903_v29 = vcombine.low %v470_v24, %v474_v25  ;;  %v891_v41 = vld [vmem:[%s1373_s4] ss:$0 sm:$0xff]  ;;  %v910_v55 = vcombine.high %v473_v50, %v477_v51  ;;  %p313_p6 = scmp.lt.s32.totalorder %s886_s19, 15  ;;  %v498_v11 = vsub.s32 4, %v481_v59  ;;  %p1032_p13 = pnand %p1031_p11, %p1384_p12 }
  0x42   : > { %v909_v57 = vcombine.low %v473_v50, %v477_v51 }
  0x43   : > { %933 = vmatmul.mubr.msk.bf16.vlgmr.msra.gmra.mrb[0].mxu0 %vm344_vm1, %v320_v4  ;;  %s1392_s19 = smov (!%p313_p6, %s886_s19), 15  ;;  %p1033_p4 = pneg %p1032_p13 }
  0x44   : > { %604 = vmatpush1.bf16.msra.mxu0 %v895_v10  ;;  %635 = vmatprep.mubr.bf16.mxu0 %v1104_v38  ;;  %s315_s12 = scalar_lea.vmem %s1375_s6, %s1392_s19  ;;  %s1034_s19 = sshll.u32 %s1105_s22, 4  ;;  %s1035_s19 = int_to_ptr.vmem [resolvable:$false] %s1034_s19 }
  0x45   : > { %605 = vmatprep.subr.bf16.mxu0 %v904_v27  ;;  %v478_v62 = vld [vmem:[%s315_s12] sm:$0xff]  ;;  %s1036_s23 = scalar_lea.vmem %s1035_s19, 2048  ;;  %p1037_p10 = scmp.lt.s32.totalorder %s1323_s11, %s1035_s19 }
  0x46   : > { %v483_v1 = vrot.slane %v478_v62, %v482_v60  ;;  %v491_v2 = vrot.slane %v478_v62, %v490_v61  ;;  %v487_v3 = vrot.slane %v478_v62, %v486_v63  ;;  %v495_v4 = vrot.slane %v478_v62, %v494_v0  ;;  %p1038_p1 = scmp.lt.s32.totalorder %s1036_s23, %s1030_s20 }
  0x47   : > { %v499_v25 = vrot.slane %v478_v62, %v498_v11  ;;  %v507_v26 = vrot.slane %v478_v62, %v506_v12 }
  0x48   : > { %606 = vmatpush1.bf16.msra.mxu0 %v903_v29  ;;  %p1039_p3 = por %p1038_p1, %p1037_p10 }
  0x49   : > { %685 = vmatprep.subr.bf16.mxu0 %v900_v36 }
  0x4a   : > { %p1040_p5 = pnand %p1039_p3, %p1033_p4 }
 0x116   : > { %v382_v16 = vpop.f32.mrb[0].mxu0 }
 0x117   : > { %v383_v17 = vadd.f32 %v887_v15, %v382_v16  ;;  %v934_v18 = vpop.f32.mrb[1].mxu0 }
 0x118   : > { %v385_v19 = vpop.f32.mrb[2].mxu0  ;;  %v510_v18 = vsub.s32 7, %v481_v59 }
 0x119   : > { %vm388_vm2 = vcmp.gt.f32.partialorder %v383_v17, 0.0  ;;  %v389_v20 = vmul.f32 0.2, %v383_v17  ;;  %v935_v21 = vpop.f32.mrb[3].mxu0 }
 0x11a   : > { %v511_v28 = vrot.slane %v478_v62, %v510_v18 }
 0x11b   : > { %v390_v22 = vsel %vm388_vm2, %v383_v17, %v389_v20  ;;  %v502_v17 = vsub.s32 5, %v481_v59 }
 0x11c   : > { %v391_v23 = vpack.c.bf16 %v390_v22, %v390_v22 }
 0x11d   : > { %v503_v27 = vrot.slane %v478_v62, %v502_v17 }
 0x11e   : > { %941 = vmatmul.mubr.msk.bf16.vlgmr.msra.gmra.mrb[0].mxu1 %vm344_vm1, %v391_v23 }
 0x11f   : > { %645 = vmatpush1.bf16.msra.mxu1 %v897_v13  ;;  %676 = vmatprep.mubr.bf16.mxu1 %v1104_v38 }
 0x120   : > { %646 = vmatprep.subr.bf16.mxu1 %v906_v31 }
 0x123   : > { %647 = vmatpush1.bf16.msra.mxu1 %v905_v30 }
 0x124   : > { %726 = vmatprep.subr.bf16.mxu1 %v902_v40 }
 0x1f1   : > { %v452_v42 = vpop.f32.mrb[0].mxu1 }
 0x1f2   : > { %v453_v43 = vadd.f32 %v891_v41, %v452_v42  ;;  %v942_v44 = vpop.f32.mrb[1].mxu1 }
 0x1f3   : > { %v455_v45 = vpop.f32.mrb[2].mxu1 }
 0x1f4   : > { %vm458_vm3 = vcmp.gt.f32.partialorder %v453_v43, 0.0  ;;  %v459_v48 = vmul.f32 0.2, %v453_v43  ;;  %v943_v49 = vpop.f32.mrb[3].mxu1 }
 0x1f6   : > { %v460_v52 = vsel %vm458_vm3, %v453_v43, %v459_v48 }
 0x1f7   : > { %v461_v53 = vpack.c.bf16 %v460_v52, %v460_v52 }
 0x1f9   : > { %911 = vmatmul.mubr.msk.bf16.vlgmr.msra.gmra.mrb[4].mxu0 %vm344_vm1, %v461_v53  ;;  %912 = vmatmul.mubr.msk.bf16.vlgmr.msra.gmra.mrb[4].mxu1 %vm344_vm1, %v461_v53 }
 0x1fa   : > { %686 = vmatpush1.bf16.msra.mxu0 %v899_v35  ;;  %727 = vmatpush1.bf16.msra.mxu1 %v901_v39 }
 0x1fb   : > { %687 = vmatprep.subr.bf16.mxu0 %v908_v54  ;;  %728 = vmatprep.subr.bf16.mxu1 %v910_v55 }
 0x1fc   : > { %717 = vmatprep.mubr.bf16.mxu0 %v1104_v38  ;;  %758 = vmatprep.mubr.bf16.mxu1 %v1104_v38 }
 0x1fe   : > { %688 = vmatpush1.bf16.msra.mxu0 %v907_v56  ;;  %729 = vmatpush1.bf16.msra.mxu1 %v909_v57 }
 0x201   : > { %913 = vmatmul.mubr.msk.bf16.vlgmr.msra.gmra.mrb[8].mxu0 %vm344_vm1, %v461_v53  ;;  %914 = vmatmul.mubr.msk.bf16.vlgmr.msra.gmra.mrb[8].mxu1 %vm344_vm1, %v461_v53 }
 0x2cc   : > { %v637_v5 = vpop.f32.mrb[4].mxu0  ;;  %v678_v6 = vpop.f32.mrb[4].mxu1 }
 0x2cd   : > { %v638_v7 = vadd.f32 %v637_v5, %v483_v1  ;;  %v679_v8 = vadd.f32 %v678_v6, %v491_v2  ;;  %v639_v9 = vpop.f32.mrb[5].mxu0  ;;  %v680_v10 = vpop.f32.mrb[5].mxu1 }
 0x2ce   : > { %v640_v13 = vadd.f32 %v639_v9, %v487_v3  ;;  %v681_v14 = vadd.f32 %v680_v10, %v495_v4  ;;  %v641_v15 = vpop.f32.mrb[6].mxu0  ;;  %v682_v16 = vpop.f32.mrb[6].mxu1 }
 0x2cf   : > { %v767_v19 = vmax.f32 %v638_v7, 0.0  ;;  %v769_v20 = vmax.f32 %v679_v8, 0.0  ;;  %v642_v21 = vpop.f32.mrb[7].mxu0  ;;  %v683_v22 = vpop.f32.mrb[7].mxu1 }
 0x2d0   : > { %v768_v23 = vmax.f32 %v640_v13, 0.0  ;;  %v770_v24 = vmax.f32 %v681_v14, 0.0 }
 0x2d1   : > { %775 = vst [vmem:[%s1310_s9] sm:$0xff] %v767_v19  ;;  %777 = vst [vmem:[%s1310_s9 + $0x10] sm:$0xff] %v769_v20 }
 0x2d2   : > { %776 = vst [vmem:[%s1310_s9 + $0x8] sm:$0xff] %v768_v23  ;;  %778 = vst [vmem:[%s1310_s9 + $0x18] sm:$0xff] %v770_v24 }
 0x2d4   : > { %v719_v29 = vpop.f32.mrb[8].mxu0  ;;  %v760_v30 = vpop.f32.mrb[8].mxu1 }
 0x2d5   : > { %v720_v31 = vadd.f32 %v719_v29, %v499_v25  ;;  %v761_v32 = vadd.f32 %v760_v30, %v507_v26  ;;  %v721_v33 = vpop.f32.mrb[9].mxu0  ;;  %v762_v34 = vpop.f32.mrb[9].mxu1 }
 0x2d6   : > { %v722_v35 = vadd.f32 %v721_v33, %v503_v27  ;;  %v763_v36 = vadd.f32 %v762_v34, %v511_v28  ;;  %v723_v37 = vpop.f32.mrb[10].mxu0  ;;  %v764_v38 = vpop.f32.mrb[10].mxu1 }
 0x2d7   : > { %v771_v39 = vmax.f32 %v720_v31, 0.0  ;;  %v773_v40 = vmax.f32 %v761_v32, 0.0  ;;  %v724_v41 = vpop.f32.mrb[11].mxu0  ;;  %v765_v42 = vpop.f32.mrb[11].mxu1 }
 0x2d8   : > { %v772_v43 = vmax.f32 %v722_v35, 0.0  ;;  %v774_v44 = vmax.f32 %v763_v36, 0.0 }
 0x2d9   : > { %779 = vst [vmem:[%s1310_s9 + $0x20] sm:$0xff] %v771_v39  ;;  %781 = vst [vmem:[%s1310_s9 + $0x30] sm:$0xff] %v773_v40 }
 0x2da   : > { %780 = vst [vmem:[%s1310_s9 + $0x28] sm:$0xff] %v772_v43  ;;  %782 = vst [vmem:[%s1310_s9 + $0x38] sm:$0xff] %v774_v44 }
 0x2db   : > { %1043 = shalt.err (!%p1040_p5)
}
 0x2dc   : > { %s1044_s17 = scalar_lea.hbm %s1321_s15, 1024  ;;  %s1048_s21 = scalar_lea.hbm %s1376_s7, 2048 }
 0x2dd   : > { %p1045_p7 = scmp.ne.s32.totalorder %s1321_s15, %s1044_s17  ;;  %p1049_p0 = scmp.lt.u32.totalorder %s1321_s15, %s1376_s7 }
 0x2de   : > { %p1050_p2 = scmp.lt.u32.totalorder %s1048_s21, %s1044_s17  ;;  %p1052_p11 = scmp.lt.u32.totalorder %s1044_s17, %s1321_s15 }
 0x2df   : > { %p1046_p8 = pnand %p1045_p7, %p1384_p12 }
 0x2e0   : > { %p1051_p6 = por %p1050_p2, %p1049_p0 }
 0x2e1   : > { %p1047_p9 = pneg %p1046_p8 }
 0x2e2   : > { %p1053_p13 = por %p1052_p11, %p1051_p6 }
 0x2e4   : > { %p1054_p4 = pnand %p1053_p13, %p1047_p9 }
 0x2e6   : > { %1057 = shalt.err (!%p1054_p4)
}
 0x2e7   : > { %946 = dma.vmem_to_hbm [thread:$0]  (%p1384_p12), %s1323_s11, 1024, %s1321_s15, %s784_s28  }
 0x2e8 PF: > { %s810_s16 = sand.u32 1, %s1084_s24   ;;  %p1385_p10 = scmp.ne.s32.totalorder %s1381_s14, 0 }
 0x2e9   : > { %p1386_p1 = scmp.ge.s32.totalorder %s1096_s27, 2  ;;  %s811_s18 = scalar_lea.sflag [#allocation4], %s810_s16 }
 0x2eb   : > { %p953_p3 = pnand %p1386_p1, %p1385_p10 }
 0x2ed   : > { %1079 = dma.done.wait (!%p953_p3), %s811_s18, 1024  }
 0x2ee   : > { %1081 = vsyncadd (!%p953_p3), %s811_s18, 4294966272  ;;  %p20_p5 = scmp.ge.s32.totalorder %s1171_s30, 4   ;;  %s1387_s24 = smov %s1088_s25 }
 0x2ef   : > { %s1388_s25 = smov %s1092_s26  ;;  %s1389_s26 = smov %s1183_s10 }
 0x2f0   : > { %s1390_s27 = smov %s1171_s30  ;;  %22 = sbr.rel (!%p20_p5) target bundleno = 5 (0x5), region = 96 }
 0x2f7   :  { %816 = vsyncpa [#allocation3], 1 }
 0x2f8   :  { %818 = vsyncpa [#allocation3 + $0x1], 1 }
 0x2f9   :  { %819 = vsyncpa [#allocation4], 1 }
 0x2fa   :  { %821 = vsyncpa [#allocation4 + $0x1], 1 }

</bundles_post_ra>
